<compile_context>
chip_gen: v5e
topology: v5e:2x2
jax: 0.10.0
libtpu: 0.0.40
codegen_flags: <defaults>
</compile_context>

<pallas_src>
import numpy as np
import jax
import jax.numpy as jnp
from jax.experimental import pallas as pl
from jax.experimental.pallas import tpu as pltpu


def mlp_kernel(x_ref, w0_ref, b0_ref, w1_ref, b1_ref, w2_ref, b2_ref,
               wout_ref, bout_ref, o_ref, h_ref):
    l = pl.program_id(1)

    # initial_layer (BatchNorm already folded into w0/b0) + ReLU, once per batch tile
    @pl.when(l == 0)
    def _():
        h0 = jnp.dot(x_ref[...], w0_ref[...],
                     preferred_element_type=jnp.float32) + b0_ref[...]
        h_ref[...] = jnp.maximum(h0, 0.0)

    # one ResidualBlock: h + linear2(relu(linear1(h)))
    h = h_ref[...]
    t = jnp.dot(h, w1_ref[0], preferred_element_type=jnp.float32) + b1_ref[0]
    t = jnp.maximum(t, 0.0)
    h = h + jnp.dot(t, w2_ref[0], preferred_element_type=jnp.float32) + b2_ref[0]
    h_ref[...] = h

    # output head (dropout == identity at inference): tanh(h @ wout + bout),
    # emitted lane-dense as a (1, tile_b) row on the last grid step of the layer axis.
    @pl.when(l == pl.num_programs(1) - 1)
    def _():
        o = jnp.dot(wout_ref[...], h.T, preferred_element_type=jnp.float32)  # (1, tile_b)
        o_ref[...] = jnp.tanh(o + bout_ref[...])


def improved_feedforward_regressor(x, params, *, tile_b=256):
    """tile_b: use a multiple of 128 (128 on v5e, 256 on v6e/v7x)."""
    assert tile_b % 128 == 0
    B, D_in = x.shape
    H = params["w0"].shape[1]
    L = params["w1"].shape[0]

    # Fold the eval-mode BatchNorm affine into the first linear layer.
    w0 = params["w0"] * params["scale"]                       # (D_in, H)
    b0 = params["b0"] * params["scale"] + params["shift"]     # (1, H)
    wout_row = params["wout"].reshape(1, H)                   # (1, H) row vector
    bout = params["bout"]                                     # (1, 1)

    # Pad batch to a multiple of tile_b (padded rows are sliced off at the end).
    num_tiles = -(-B // tile_b)
    B_pad = num_tiles * tile_b
    if B_pad != B:
        x = jnp.pad(x, ((0, B_pad - B), (0, 0)))

    grid = (num_tiles, L)

    in_specs = [
        pl.BlockSpec((tile_b, D_in), lambda i, l: (i, 0)),     # x
        pl.BlockSpec((D_in, H),      lambda i, l: (0, 0)),     # w0 (BN folded)
        pl.BlockSpec((1, H),         lambda i, l: (0, 0)),     # b0 (BN folded)
        pl.BlockSpec((1, H, H),      lambda i, l: (l, 0, 0)),  # w1[l]
        pl.BlockSpec((1, 1, H),      lambda i, l: (l, 0, 0)),  # b1[l]
        pl.BlockSpec((1, H, H),      lambda i, l: (l, 0, 0)),  # w2[l]
        pl.BlockSpec((1, 1, H),      lambda i, l: (l, 0, 0)),  # b2[l]
        pl.BlockSpec((1, H),         lambda i, l: (0, 0)),     # wout (row)
        pl.BlockSpec((1, 1),         lambda i, l: (0, 0)),     # bout
    ]
    # Lane-dense output slab: (1, B_pad), block (1, tile_b).
    out_spec = pl.BlockSpec((1, tile_b), lambda i, l: (0, i))

    out = pl.pallas_call(
        mlp_kernel,
        out_shape=jax.ShapeDtypeStruct((1, B_pad), jnp.float32),
        grid_spec=pltpu.PrefetchScalarGridSpec(
            num_scalar_prefetch=0,
            grid=grid,
            in_specs=in_specs,
            out_specs=out_spec,
            scratch_shapes=[pltpu.VMEM((tile_b, H), jnp.float32)],  # h resident across L
        ),
        compiler_params=pltpu.CompilerParams(
            dimension_semantics=("parallel", "arbitrary")),
    )(x, w0, b0, params["w1"], params["b1"], params["w2"], params["b2"],
      wout_row, bout)

    return out.reshape(B_pad, 1)[:B]


def init_params(key, input_dim, hidden_dim, num_layers):
    """Deterministic synthetic parameters (PyTorch nn.Linear-style uniform init)."""
    def linear(k, fan_in, fan_out):
        bound = 1.0 / np.sqrt(fan_in)
        kw, kb = jax.random.split(k)
        w = jax.random.uniform(kw, (fan_in, fan_out), jnp.float32, -bound, bound)
        b = jax.random.uniform(kb, (fan_out,), jnp.float32, -bound, bound)
        return w, b

    keys = jax.random.split(key, 2 * num_layers + 2)

    w0, b0 = linear(keys[0], input_dim, hidden_dim)

    # BatchNorm1d (eval): default PyTorch init -> gamma=1, beta=0, mean=0, var=1
    eps = 1e-5
    gamma = jnp.ones((hidden_dim,), jnp.float32)
    beta = jnp.zeros((hidden_dim,), jnp.float32)
    running_mean = jnp.zeros((hidden_dim,), jnp.float32)
    running_var = jnp.ones((hidden_dim,), jnp.float32)
    scale = gamma / jnp.sqrt(running_var + eps)
    shift = beta - running_mean * scale

    w1s, b1s, w2s, b2s = [], [], [], []
    for l in range(num_layers):
        w1, b1 = linear(keys[1 + 2 * l], hidden_dim, hidden_dim)
        w2, b2 = linear(keys[2 + 2 * l], hidden_dim, hidden_dim)
        w1s.append(w1); b1s.append(b1); w2s.append(w2); b2s.append(b2)

    wout, bout = linear(keys[-1], hidden_dim, 1)

    return {
        "w0": w0, "b0": b0.reshape(1, hidden_dim),
        "scale": scale.reshape(1, hidden_dim), "shift": shift.reshape(1, hidden_dim),
        "w1": jnp.stack(w1s), "b1": jnp.stack(b1s).reshape(num_layers, 1, hidden_dim),
        "w2": jnp.stack(w2s), "b2": jnp.stack(b2s).reshape(num_layers, 1, hidden_dim),
        "wout": wout, "bout": bout.reshape(1, 1),
    }


def reference(x, p):
    h = x @ p["w0"] + p["b0"]
    h = h * p["scale"] + p["shift"]
    h = jnp.maximum(h, 0.0)
    for l in range(p["w1"].shape[0]):
        t = jnp.maximum(h @ p["w1"][l] + p["b1"][l], 0.0)
        h = h + t @ p["w2"][l] + p["b2"][l]
    return jnp.tanh(h @ p["wout"] + p["bout"])


if __name__ == "__main__":
    input_dim, hidden_dim, num_layers = 32, 64, 4
    batch = 500          # not a tile multiple -> exercises padding; pads to 2 tiles of 256

    key = jax.random.PRNGKey(0)
    kx, kp = jax.random.split(key)
    x = jax.random.normal(kx, (batch, input_dim), jnp.float32)
    params = init_params(kp, input_dim, hidden_dim, num_layers)

    out = improved_feedforward_regressor(x, params, tile_b=256)
    out = jax.block_until_ready(out)

    ref = reference(x, params)
    np.testing.assert_allclose(np.asarray(out), np.asarray(ref), rtol=1e-5, atol=1e-5)
    print("KERNEL_OK")
</pallas_src>

<mosaic_0001>
module attributes {stable_mosaic.version = 11 : i64} {
  func.func @mlp_kernel(%arg0: i32, %arg1: i32, %arg2: memref<256x32xf32, #tpu.memory_space<vmem>>, %arg3: memref<32x64xf32, #tpu.memory_space<vmem>>, %arg4: memref<1x64xf32, #tpu.memory_space<vmem>>, %arg5: memref<1x64x64xf32, #tpu.memory_space<vmem>>, %arg6: memref<1x1x64xf32, #tpu.memory_space<vmem>>, %arg7: memref<1x64x64xf32, #tpu.memory_space<vmem>>, %arg8: memref<1x1x64xf32, #tpu.memory_space<vmem>>, %arg9: memref<1x64xf32, #tpu.memory_space<vmem>>, %arg10: memref<1x1xf32, #tpu.memory_space<vmem>>, %arg11: memref<1x256xf32, #tpu.memory_space<vmem>>, %arg12: memref<256x64xf32, #tpu.memory_space<vmem>>) attributes {dimension_semantics = [#tpu.dimension_semantics<parallel>, #tpu.dimension_semantics<arbitrary>], iteration_bounds = array<i64: 2, 4>, scalar_prefetch = 0 : i64, scratch_operands = 1 : i64, tpu.core_type = #tpu.core_type<tc>, window_params = [{transform_indices = @transform_0, window_bounds = array<i64: 256, 32>}, {pipeline_mode = #tpu.pipeline_mode<synchronous>, transform_indices = @transform_1, window_bounds = array<i64: 32, 64>}, {pipeline_mode = #tpu.pipeline_mode<synchronous>, transform_indices = @transform_2, window_bounds = array<i64: 1, 64>}, {transform_indices = @transform_3, window_bounds = array<i64: 1, 64, 64>}, {transform_indices = @transform_4, window_bounds = array<i64: 1, 1, 64>}, {transform_indices = @transform_5, window_bounds = array<i64: 1, 64, 64>}, {transform_indices = @transform_6, window_bounds = array<i64: 1, 1, 64>}, {pipeline_mode = #tpu.pipeline_mode<synchronous>, transform_indices = @transform_7, window_bounds = array<i64: 1, 64>}, {pipeline_mode = #tpu.pipeline_mode<synchronous>, transform_indices = @transform_8, window_bounds = array<i64: 1, 1>}, {transform_indices = @transform_9, window_bounds = array<i64: 1, 256>}]} {
    %c0_i32 = arith.constant 0 : i32
    %0 = arith.cmpi eq, %arg1, %c0_i32 : i32
    %1 = arith.extui %0 : i1 to i32
    %c0_i32_0 = arith.constant 0 : i32
    %2 = arith.cmpi ne, %1, %c0_i32_0 : i32
    scf.if %2 {
      %c0_19 = arith.constant 0 : index
      %c0_20 = arith.constant 0 : index
      %25 = vector.load %arg2[%c0_19, %c0_20] : memref<256x32xf32, #tpu.memory_space<vmem>>, vector<256x32xf32>
      %c0_21 = arith.constant 0 : index
      %c0_22 = arith.constant 0 : index
      %26 = vector.load %arg3[%c0_21, %c0_22] : memref<32x64xf32, #tpu.memory_space<vmem>>, vector<32x64xf32>
      %cst_23 = arith.constant dense<0.000000e+00> : vector<256x64xf32>
      %27 = tpu.matmul %25, %26, %cst_23 {dimension_numbers = #tpu.dot_dimension_numbers<[1], [0], [0], [1], [0, 0, 1, 1], [], []>} : vector<256x32xf32>, vector<32x64xf32>, vector<256x64xf32> -> vector<256x64xf32>
      %c0_24 = arith.constant 0 : index
      %c0_25 = arith.constant 0 : index
      %28 = vector.load %arg4[%c0_24, %c0_25] : memref<1x64xf32, #tpu.memory_space<vmem>>, vector<1x64xf32>
      %29 = vector.broadcast %28 : vector<1x64xf32> to vector<256x64xf32>
      %30 = arith.addf %27, %29 : vector<256x64xf32>
      %cst_26 = arith.constant 0.000000e+00 : f32
      %31 = vector.broadcast %cst_26 : f32 to vector<256x64xf32>
      %32 = arith.maximumf %30, %31 : vector<256x64xf32>
      %c0_27 = arith.constant 0 : index
      %c0_28 = arith.constant 0 : index
      %33 = vector.load %arg12[%c0_27, %c0_28] : memref<256x64xf32, #tpu.memory_space<vmem>>, vector<256x64xf32>
      tpu.vector_store %arg12[%c0_27, %c0_28], %32 {strides = array<i32>} : memref<256x64xf32, #tpu.memory_space<vmem>>, vector<256x64xf32>,
    } else {
    }
    %c0 = arith.constant 0 : index
    %c0_1 = arith.constant 0 : index
    %3 = vector.load %arg12[%c0, %c0_1] : memref<256x64xf32, #tpu.memory_space<vmem>>, vector<256x64xf32>
    %c0_2 = arith.constant 0 : index
    %c0_3 = arith.constant 0 : index
    %c0_4 = arith.constant 0 : index
    %4 = vector.load %arg5[%c0_2, %c0_3, %c0_4] : memref<1x64x64xf32, #tpu.memory_space<vmem>>, vector<1x64x64xf32>
    %5 = vector.shape_cast %4 : vector<1x64x64xf32> to vector<64x64xf32>
    %cst = arith.constant dense<0.000000e+00> : vector<256x64xf32>
    %6 = tpu.matmul %3, %5, %cst {dimension_numbers = #tpu.dot_dimension_numbers<[1], [0], [0], [1], [0, 0, 1, 1], [], []>} : vector<256x64xf32>, vector<64x64xf32>, vector<256x64xf32> -> vector<256x64xf32>
    %c0_5 = arith.constant 0 : index
    %c0_6 = arith.constant 0 : index
    %c0_7 = arith.constant 0 : index
    %7 = vector.load %arg6[%c0_5, %c0_6, %c0_7] : memref<1x1x64xf32, #tpu.memory_space<vmem>>, vector<1x1x64xf32>
    %8 = vector.shape_cast %7 : vector<1x1x64xf32> to vector<1x64xf32>
    %9 = vector.broadcast %8 : vector<1x64xf32> to vector<256x64xf32>
    %10 = arith.addf %6, %9 : vector<256x64xf32>
    %cst_8 = arith.constant 0.000000e+00 : f32
    %11 = vector.broadcast %cst_8 : f32 to vector<256x64xf32>
    %12 = arith.maximumf %10, %11 : vector<256x64xf32>
    %c0_9 = arith.constant 0 : index
    %c0_10 = arith.constant 0 : index
    %c0_11 = arith.constant 0 : index
    %13 = vector.load %arg7[%c0_9, %c0_10, %c0_11] : memref<1x64x64xf32, #tpu.memory_space<vmem>>, vector<1x64x64xf32>
    %14 = vector.shape_cast %13 : vector<1x64x64xf32> to vector<64x64xf32>
    %cst_12 = arith.constant dense<0.000000e+00> : vector<256x64xf32>
    %15 = tpu.matmul %12, %14, %cst_12 {dimension_numbers = #tpu.dot_dimension_numbers<[1], [0], [0], [1], [0, 0, 1, 1], [], []>} : vector<256x64xf32>, vector<64x64xf32>, vector<256x64xf32> -> vector<256x64xf32>
    %16 = arith.addf %3, %15 : vector<256x64xf32>
    %c0_13 = arith.constant 0 : index
    %c0_14 = arith.constant 0 : index
    %c0_15 = arith.constant 0 : index
    %17 = vector.load %arg8[%c0_13, %c0_14, %c0_15] : memref<1x1x64xf32, #tpu.memory_space<vmem>>, vector<1x1x64xf32>
    %18 = vector.shape_cast %17 : vector<1x1x64xf32> to vector<1x64xf32>
    %19 = vector.broadcast %18 : vector<1x64xf32> to vector<256x64xf32>
    %20 = arith.addf %16, %19 : vector<256x64xf32>
    %c0_16 = arith.constant 0 : index
    %c0_17 = arith.constant 0 : index
    %21 = vector.load %arg12[%c0_16, %c0_17] : memref<256x64xf32, #tpu.memory_space<vmem>>, vector<256x64xf32>
    tpu.vector_store %arg12[%c0_16, %c0_17], %20 {strides = array<i32>} : memref<256x64xf32, #tpu.memory_space<vmem>>, vector<256x64xf32>,
    %c3_i32 = arith.constant 3 : i32
    %22 = arith.cmpi eq, %arg1, %c3_i32 : i32
    %23 = arith.extui %22 : i1 to i32
    %c0_i32_18 = arith.constant 0 : i32
    %24 = arith.cmpi ne, %23, %c0_i32_18 : i32
    scf.if %24 {
      %c0_19 = arith.constant 0 : index
      %c0_20 = arith.constant 0 : index
      %25 = vector.load %arg9[%c0_19, %c0_20] : memref<1x64xf32, #tpu.memory_space<vmem>>, vector<1x64xf32>
      %26 = tpu.transpose %20, [1, 0] : vector<256x64xf32> -> vector<64x256xf32>
      %cst_21 = arith.constant dense<0.000000e+00> : vector<1x256xf32>
      %27 = tpu.matmul %25, %26, %cst_21 {dimension_numbers = #tpu.dot_dimension_numbers<[1], [0], [0], [1], [0, 0, 1, 1], [], []>} : vector<1x64xf32>, vector<64x256xf32>, vector<1x256xf32> -> vector<1x256xf32>
      %c0_22 = arith.constant 0 : index
      %c0_23 = arith.constant 0 : index
      %28 = vector.load %arg10[%c0_22, %c0_23] : memref<1x1xf32, #tpu.memory_space<vmem>>, vector<1x1xf32>
      %29 = vector.broadcast %28 : vector<1x1xf32> to vector<1x256xf32>
      %30 = arith.addf %27, %29 : vector<1x256xf32>
      %31 = math.tanh %30 : vector<1x256xf32>
      %c0_24 = arith.constant 0 : index
      %c0_25 = arith.constant 0 : index
      %32 = vector.load %arg11[%c0_24, %c0_25] : memref<1x256xf32, #tpu.memory_space<vmem>>, vector<1x256xf32>
      tpu.vector_store %arg11[%c0_24, %c0_25], %31 {strides = array<i32>} : memref<1x256xf32, #tpu.memory_space<vmem>>, vector<1x256xf32>,
    } else {
    }
    return
  }
  func.func @transform_0(%arg0: i32, %arg1: i32) -> (i32, i32) {
    %c0_i32 = arith.constant 0 : i32
    %c0_i32_0 = arith.constant 0 : i32
    return %arg0, %c0_i32 : i32, i32
  }
  func.func @transform_1(%arg0: i32, %arg1: i32) -> (i32, i32) {
    %c0_i32 = arith.constant 0 : i32
    %c0_i32_0 = arith.constant 0 : i32
    %c0_i32_1 = arith.constant 0 : i32
    return %c0_i32, %c0_i32_0 : i32, i32
  }
  func.func @transform_2(%arg0: i32, %arg1: i32) -> (i32, i32) {
    %c0_i32 = arith.constant 0 : i32
    %c0_i32_0 = arith.constant 0 : i32
    %c0_i32_1 = arith.constant 0 : i32
    return %c0_i32, %c0_i32_0 : i32, i32
  }
  func.func @transform_3(%arg0: i32, %arg1: i32) -> (i32, i32, i32) {
    %c0_i32 = arith.constant 0 : i32
    %c0_i32_0 = arith.constant 0 : i32
    %c0_i32_1 = arith.constant 0 : i32
    return %arg1, %c0_i32, %c0_i32_0 : i32, i32, i32
  }
  func.func @transform_4(%arg0: i32, %arg1: i32) -> (i32, i32, i32) {
    %c0_i32 = arith.constant 0 : i32
    %c0_i32_0 = arith.constant 0 : i32
    %c0_i32_1 = arith.constant 0 : i32
    return %arg1, %c0_i32, %c0_i32_0 : i32, i32, i32
  }
  func.func @transform_5(%arg0: i32, %arg1: i32) -> (i32, i32, i32) {
    %c0_i32 = arith.constant 0 : i32
    %c0_i32_0 = arith.constant 0 : i32
    %c0_i32_1 = arith.constant 0 : i32
    return %arg1, %c0_i32, %c0_i32_0 : i32, i32, i32
  }
  func.func @transform_6(%arg0: i32, %arg1: i32) -> (i32, i32, i32) {
    %c0_i32 = arith.constant 0 : i32
    %c0_i32_0 = arith.constant 0 : i32
    %c0_i32_1 = arith.constant 0 : i32
    return %arg1, %c0_i32, %c0_i32_0 : i32, i32, i32
  }
  func.func @transform_7(%arg0: i32, %arg1: i32) -> (i32, i32) {
    %c0_i32 = arith.constant 0 : i32
    %c0_i32_0 = arith.constant 0 : i32
    %c0_i32_1 = arith.constant 0 : i32
    return %c0_i32, %c0_i32_0 : i32, i32
  }
  func.func @transform_8(%arg0: i32, %arg1: i32) -> (i32, i32) {
    %c0_i32 = arith.constant 0 : i32
    %c0_i32_0 = arith.constant 0 : i32
    %c0_i32_1 = arith.constant 0 : i32
    return %c0_i32, %c0_i32_0 : i32, i32
  }
  func.func @transform_9(%arg0: i32, %arg1: i32) -> (i32, i32) {
    %c0_i32 = arith.constant 0 : i32
    %c0_i32_0 = arith.constant 0 : i32
    return %c0_i32, %arg0 : i32, i32
  }
}

</mosaic_0001>

<bundles_post_ra>
// kernel: tpu_custom_call.1
= control target key start
LH: loop header
LB: loop body
LE: loop exit
PB: predicated region body
PF: predicated region fallthrough
CT: control target
= control target key end

     0   :  { %s2768_s0 = inlined_call_operand.vmem [shape: f32[512,32], index: 0, kind: input, shape index: {}]   ;;  %s2769_s1 = inlined_call_operand.vmem [shape: f32[32,64], index: 1, kind: input, shape index: {}]   ;;  %s2770_s2 = inlined_call_operand.vmem [shape: f32[1,64], index: 2, kind: input, shape index: {}]   ;;  %s2771_s3 = inlined_call_operand.vmem [shape: f32[4,64,64], index: 3, kind: input, shape index: {}]   ;;  %s2772_s4 = inlined_call_operand.vmem [shape: f32[4,1,64], index: 4, kind: input, shape index: {}]   ;;  %s2773_s5 = inlined_call_operand.vmem [shape: f32[4,64,64], index: 5, kind: input, shape index: {}]   ;;  %s2774_s6 = inlined_call_operand.vmem [shape: f32[4,1,64], index: 6, kind: input, shape index: {}]   ;;  %s2775_s7 = inlined_call_operand.vmem [shape: f32[1,64], index: 7, kind: input, shape index: {}]   ;;  %s2776_s8 = inlined_call_operand.<no memory space> [shape: f32[1,1], index: 8, kind: input, shape index: {}]   ;;  %s2777_s9 = inlined_call_operand.hbm [shape: f32[1,512], index: 9, kind: output, shape index: {}]  }
   0x1   :  { %v14_v0 = vstv %s2776_s8 }
   0x2   :  { %15 = vst [vmem:[#allocation3] sm:$0x1] %v14_v0 }
   0x3   :  { %16 = vsyncpa [#allocation5], 0 }
   0x4   :  { %18 = vsyncpa [#allocation5 + $0x1], 0  ;;  %s2038_s11 = smov 0   ;;  %s2040_s12 = smov 0  }
   0x5   :  { %s2042_s13 = smov 0   ;;  %s2044_s14 = smov 0  }
   0x6   :  { %s2046_s15 = smov 0   ;;  %s2048_s16 = smov 0  }
   0x7   :  { %s2050_s17 = smov 0   ;;  %s2052_s18 = smov 0  }
   0x8 LB: > { %2787 = sst [smem:[#allocation7_spill]] %s1954_s11  ;;  %s1630_s8 = sadd.s32 4294967295, %s1982_s18   ;;  %s1982_s18 = sphi %s2052_s18, %s24_s18   ;;  %s1978_s17 = sphi %s2050_s17, %s2807_s17   ;;  %s1974_s16 = sphi %s2048_s16, %s2806_s16   ;;  %s1970_s15 = sphi %s2046_s15, %s2805_s15   ;;  %s1966_s14 = sphi %s2044_s14, %s2804_s14   ;;  %s1962_s13 = sphi %s2042_s13, %s2803_s13   ;;  %s1958_s12 = sphi %s2040_s12, %s2809_s12   ;;  %s1954_s11 = sphi %s2038_s11, %s2808_s11  }
   0x9   : > { %2788 = sst [smem:[#allocation8_spill]] %s1962_s13  ;;  %s1631_s19 = sadd.s32 4294967294, %s1982_s18  }
   0xa   : > { %2789 = sst [smem:[#allocation9_spill]] %s1974_s16  ;;  %s33_s20 = sadd.s32 1, %s1974_s16 }
   0xb   : > { %2790 = sst [smem:[#allocation10_spill]] %s1978_s17  ;;  %p34_p0 = scmp.ge.s32.totalorder %s33_s20, 4 }
   0xc   : > { %2791 = sst [smem:[#allocation11_spill]] %s1982_s18  ;;  %s36_s21 = sadd.s32 1, %s1978_s17 }
   0xd   : > { %p267_p1 = scmp.ne.s32.totalorder %s1962_s13, %s1958_s12  ;;  %p268_p2 = scmp.eq.s32.totalorder %s1630_s8, 7 }
   0xe   : > { %s2811_s20 = smov (%p34_p0, %s33_s20), 0  ;;  %s2813_s21 = smov (!%p34_p0, %s36_s21), %s1978_s17 }
   0xf   : > { %2792 = sst [smem:[#allocation12_spill]] %s2811_s20  ;;  %p2087_p3 = por %p268_p2, %p267_p1 }
  0x10   : > { %p273_p4 = scmp.ne.s32.totalorder %s1958_s12, %s1954_s11  ;;  %p38_p5 = scmp.ge.s32.totalorder %s2813_s21, 2 }
  0x11   : > { %p274_p6 = scmp.eq.s32.totalorder %s1631_s19, 7  ;;  %p1634_p7 = scmp.ge.s32.totalorder %s1982_s18, 1 }
  0x12   : > { %p341_p8 = scmp.lt.s32.totalorder %s1982_s18, 9  ;;  %s2815_s21 = smov (%p38_p5, %s2813_s21), 0 }
  0x13   : > { %2794 = sst [smem:[#allocation13_spill]] %s2815_s21  ;;  %p2097_p9 = por %p274_p6, %p273_p4 }
  0x14   : > { %p342_p10 = pnand %p1634_p7, %p341_p8  ;;  %s254_s24 = ssub.s32 %s1978_s17, %s2815_s21 }
  0x15   : > { %s2795_s23 = scalar_select %p2097_p9, 1, 0 }
  0x16   : > { %s257_s25 = sadd.s32 1, %s1962_s13  ;;  %p255_p11 = scmp.eq.s32.totalorder %s254_s24, 0 }
  0x17   : > { %2796 = sst [smem:[#allocation14_spill]] %s2795_s23  ;;  %345 = sbr.rel (%p342_p10) target bundleno = 864 (0x360), region = 56 }
  0x18   : > { %s2105_s26 = scalar_select %p255_p11, %s1962_s13, %s257_s25  }
  0x19   : > { %s2779_s27 = sand.u32 (!%p342_p10), 1, %s1958_s12   ;;  %s1636_s28 = sshll.u32 (!%p342_p10), %s1970_s15, 5 }
  0x1a   : > { %2797 = sst [smem:[#allocation15_spill]] %s2105_s26  ;;  %s2111_s29 = sshll.u32 (!%p342_p10), %s2779_s27, 1 }
  0x1b   : > { %p394_p12 = scmp.lt.s32.totalorder (!%p342_p10), %s1636_s28, 63  ;;  %p399_p13 = scmp.lt.s32.totalorder (!%p342_p10), %s1966_s14, 3 }
  0x1c   : > { %s392_s8 = scalar_lea.vmem [#allocation4], %s2111_s29  ;;  %p1642_p0 = scmp.ne.s32.totalorder %s1966_s14, 0 }
  0x1d   : > { %s2817_s28 = smov (!%p394_p12, %s1636_s28), 63 }
  0x1e   : > { %s2115_s30 = scalar_select %p399_p13, %s1966_s14, 3 }
  0x1f   : > { %s1637_s10 = sshll.u32 %s2817_s28, 3  ;;  %419 = sbr.rel (%p1642_p0) target bundleno = 238 (0xee), region = 60 }
  0x20   : > { %s2120_s24 = scalar_lea.vmem %s2768_s0, %s1637_s10  ;;  %s1778_s25 = sshll.u32 %s2115_s30, 6 }
  0x21   : > { %s2126_s27 = scalar_lea.vmem %s2771_s3, %s1778_s25  ;;  %s406_s26 = scalar_lea.vmem %s2772_s4, %s2115_s30 }
  0x22   : > { %s2135_s11 = scalar_lea.vmem %s2773_s5, %s1778_s25  ;;  %s414_s10 = scalar_lea.vmem %s2774_s6, %s2115_s30 }
  0x24   : > { %v455_v1 = vld [vmem:[%s2769_s1 + $0x18] sm:$0xff]  ;;  %v454_v2 = vld [vmem:[%s2769_s1 + $0x10] sm:$0xff]  ;;  %v453_v3 = vld [vmem:[%s2769_s1 + $0x8] sm:$0xff]  ;;  %vm460_vm0 = vcmask 261120   ;;  %vm702_vm1 = vcmask 523264  }
  0x25   : > { %1781 = vmatpush.msra.mxu2 %v455_v1  ;;  %1782 = vmatpush.msra.mxu3 %v455_v1  ;;  %v452_v4 = vld [vmem:[%s2769_s1] sm:$0xff]  ;;  %v437_v9 = vld [vmem:[%s2120_s24 + $0x88] sm:$0xff]  ;;  %v438_v13 = vld [vmem:[%s2120_s24 + $0x90] sm:$0xff] }
  0x26   : > { %569 = vmatpush.msra.mxu0 %v455_v1  ;;  %1780 = vmatpush.msra.mxu1 %v455_v1  ;;  %v436_v5 = vld [vmem:[%s2120_s24 + $0x80] sm:$0xff]  ;;  %v445_v10 = vld [vmem:[%s2120_s24 + $0xc8] sm:$0xff]  ;;  %v446_v14 = vld [vmem:[%s2120_s24 + $0xd0] sm:$0xff] }
  0x27   : > { %1784 = vmatpush.msra.mxu2 %v454_v2  ;;  %1785 = vmatpush.msra.mxu3 %v454_v2  ;;  %v444_v6 = vld [vmem:[%s2120_s24 + $0xc0] sm:$0xff]  ;;  %v421_v11 = vld [vmem:[%s2120_s24 + $0x8] sm:$0xff]  ;;  %v422_v15 = vld [vmem:[%s2120_s24 + $0x10] sm:$0xff] }
  0x28   : > { %570 = vmatpush.msra.mxu0 %v454_v2  ;;  %1783 = vmatpush.msra.mxu1 %v454_v2  ;;  %v420_v7 = vld [vmem:[%s2120_s24] sm:$0xff]  ;;  %v429_v12 = vld [vmem:[%s2120_s24 + $0x48] sm:$0xff]  ;;  %v430_v16 = vld [vmem:[%s2120_s24 + $0x50] sm:$0xff] }
  0x29   : > { %1787 = vmatpush.msra.mxu2 %v453_v3  ;;  %1788 = vmatpush.msra.mxu3 %v453_v3  ;;  %v428_v8 = vld [vmem:[%s2120_s24 + $0x40] sm:$0xff]  ;;  %v439_v17 = vld [vmem:[%s2120_s24 + $0x98] sm:$0xff]  ;;  %v441_v25 = vld [vmem:[%s2120_s24 + $0xa8] sm:$0xff] }
  0x2a   : > { %571 = vmatpush.msra.mxu0 %v453_v3  ;;  %1786 = vmatpush.msra.mxu1 %v453_v3  ;;  %v447_v18 = vld [vmem:[%s2120_s24 + $0xd8] sm:$0xff]  ;;  %v440_v21 = vld [vmem:[%s2120_s24 + $0xa0] sm:$0xff]  ;;  %v449_v26 = vld [vmem:[%s2120_s24 + $0xe8] sm:$0xff] }
  0x2b   : > { %1790 = vmatpush.msra.mxu2 %v452_v4  ;;  %1791 = vmatpush.msra.mxu3 %v452_v4  ;;  %v423_v19 = vld [vmem:[%s2120_s24 + $0x18] sm:$0xff]  ;;  %v448_v22 = vld [vmem:[%s2120_s24 + $0xe0] sm:$0xff]  ;;  %v425_v27 = vld [vmem:[%s2120_s24 + $0x28] sm:$0xff] }
  0x2c   : > { %1659 = vmatmul.msk.f32.vlgmr.msra.gmra.mxu2 %vm460_vm0, %v436_v5  ;;  %1667 = vmatmul.msk.f32.vlgmr.msra.gmra.mxu3 %vm460_vm0, %v444_v6  ;;  %v431_v20 = vld [vmem:[%s2120_s24 + $0x58] sm:$0xff]  ;;  %v424_v23 = vld [vmem:[%s2120_s24 + $0x20] sm:$0xff]  ;;  %v433_v28 = vld [vmem:[%s2120_s24 + $0x68] sm:$0xff] }
  0x2d   : > { %572 = vmatpush.msra.mxu0 %v452_v4  ;;  %1789 = vmatpush.msra.mxu1 %v452_v4  ;;  %v432_v24 = vld [vmem:[%s2120_s24 + $0x60] sm:$0xff]  ;;  %v442_v29 = vld [vmem:[%s2120_s24 + $0xb0] sm:$0xff]  ;;  %v443_v33 = vld [vmem:[%s2120_s24 + $0xb8] sm:$0xff] }
  0x2e   : > { %1643 = vmatmul.msk.f32.vlgmr.msra.gmra.mxu0 %vm460_vm0, %v420_v7  ;;  %1651 = vmatmul.msk.f32.vlgmr.msra.gmra.mxu1 %vm460_vm0, %v428_v8  ;;  %v450_v30 = vld [vmem:[%s2120_s24 + $0xf0] sm:$0xff]  ;;  %v451_v34 = vld [vmem:[%s2120_s24 + $0xf8] sm:$0xff]  ;;  %v2222_v37 = vld [vmem:[%s2770_s2] ss:$0 sm:$0xff] }
  0x2f   : > { %v426_v31 = vld [vmem:[%s2120_s24 + $0x30] sm:$0xff]  ;;  %v427_v35 = vld [vmem:[%s2120_s24 + $0x38] sm:$0xff] }
  0x30   : > { %v434_v32 = vld [vmem:[%s2120_s24 + $0x70] sm:$0xff]  ;;  %v435_v36 = vld [vmem:[%s2120_s24 + $0x78] sm:$0xff] }
  0x34   : > { %1660 = vmatmul.msk.f32.gmra.mxu2 %vm460_vm0, %v437_v9  ;;  %1668 = vmatmul.msk.f32.gmra.mxu3 %vm460_vm0, %v445_v10 }
  0x36   : > { %1644 = vmatmul.msk.f32.gmra.mxu0 %vm460_vm0, %v421_v11  ;;  %1652 = vmatmul.msk.f32.gmra.mxu1 %vm460_vm0, %v429_v12 }
  0x3c   : > { %1661 = vmatmul.msk.f32.gmra.mxu2 %vm460_vm0, %v438_v13  ;;  %1669 = vmatmul.msk.f32.gmra.mxu3 %vm460_vm0, %v446_v14 }
  0x3e   : > { %1645 = vmatmul.msk.f32.gmra.mxu0 %vm460_vm0, %v422_v15  ;;  %1653 = vmatmul.msk.f32.gmra.mxu1 %vm460_vm0, %v430_v16 }
  0x44   : > { %1662 = vmatmul.msk.f32.gmra.mxu2 %vm460_vm0, %v439_v17  ;;  %1670 = vmatmul.msk.f32.gmra.mxu3 %vm460_vm0, %v447_v18 }
  0x46   : > { %1646 = vmatmul.msk.f32.gmra.mxu0 %vm460_vm0, %v423_v19  ;;  %1654 = vmatmul.msk.f32.gmra.mxu1 %vm460_vm0, %v431_v20 }
  0x4c   : > { %1663 = vmatmul.msk.f32.gmra.mxu2 %vm460_vm0, %v440_v21  ;;  %1671 = vmatmul.msk.f32.gmra.mxu3 %vm460_vm0, %v448_v22 }
  0x4e   : > { %1647 = vmatmul.msk.f32.gmra.mxu0 %vm460_vm0, %v424_v23  ;;  %1655 = vmatmul.msk.f32.gmra.mxu1 %vm460_vm0, %v432_v24 }
  0x54   : > { %1664 = vmatmul.msk.f32.gmra.mxu2 %vm460_vm0, %v441_v25  ;;  %1672 = vmatmul.msk.f32.gmra.mxu3 %vm460_vm0, %v449_v26 }
  0x56   : > { %1648 = vmatmul.msk.f32.gmra.mxu0 %vm460_vm0, %v425_v27  ;;  %1656 = vmatmul.msk.f32.gmra.mxu1 %vm460_vm0, %v433_v28 }
  0x5c   : > { %1665 = vmatmul.msk.f32.gmra.mxu2 %vm460_vm0, %v442_v29  ;;  %1673 = vmatmul.msk.f32.gmra.mxu3 %vm460_vm0, %v450_v30 }
  0x5e   : > { %1649 = vmatmul.msk.f32.gmra.mxu0 %vm460_vm0, %v426_v31  ;;  %1657 = vmatmul.msk.f32.gmra.mxu1 %vm460_vm0, %v434_v32 }
  0x64   : > { %1666 = vmatmul.msk.f32.gmra.mxu2 %vm460_vm0, %v443_v33  ;;  %1674 = vmatmul.msk.f32.gmra.mxu3 %vm460_vm0, %v451_v34 }
  0x66   : > { %1650 = vmatmul.msk.f32.gmra.mxu0 %vm460_vm0, %v427_v35  ;;  %1658 = vmatmul.msk.f32.gmra.mxu1 %vm460_vm0, %v435_v36 }
  0xab   : > { %v574_v38 = vpop.f32.mrf.mxu0  ;;  %v598_v39 = vpop.f32.mrf.mxu1 }
  0xac   : > { %v575_v40 = vadd.f32 %v2222_v37, %v574_v38  ;;  %v599_v41 = vadd.f32 %v2222_v37, %v598_v39 }
  0xae   : > { %v670_v42 = vmax.f32 %v575_v40, 0.0  ;;  %v678_v43 = vmax.f32 %v599_v41, 0.0 }
  0xaf   : > { %v622_v44 = vpop.f32.mrf.mxu2  ;;  %v646_v45 = vpop.f32.mrf.mxu3 }
  0xb0   : > { %703 = vst.msk [vmem:[#allocation2] sm:$0xff] %vm702_vm1, %v670_v42  ;;  %v623_v46 = vadd.f32 %v2222_v37, %v622_v44  ;;  %v647_v47 = vadd.f32 %v2222_v37, %v646_v45 }
  0xb1   : > { %711 = vst.msk [vmem:[#allocation2 + $0x40] sm:$0xff] %vm702_vm1, %v678_v43 }
  0xb2   : > { %v686_v48 = vmax.f32 %v623_v46, 0.0  ;;  %v694_v49 = vmax.f32 %v647_v47, 0.0 }
  0xb3   : > { %v577_v50 = vpop.f32.mrf.mxu0  ;;  %v601_v51 = vpop.f32.mrf.mxu1 }
  0xb4   : > { %719 = vst.msk [vmem:[#allocation2 + $0x80] sm:$0xff] %vm702_vm1, %v686_v48  ;;  %v578_v52 = vadd.f32 %v2222_v37, %v577_v50  ;;  %v602_v53 = vadd.f32 %v2222_v37, %v601_v51 }
  0xb5   : > { %727 = vst.msk [vmem:[#allocation2 + $0xc0] sm:$0xff] %vm702_vm1, %v694_v49 }
  0xb6   : > { %v671_v54 = vmax.f32 %v578_v52, 0.0  ;;  %v679_v55 = vmax.f32 %v602_v53, 0.0 }
  0xb7   : > { %v625_v56 = vpop.f32.mrf.mxu2  ;;  %v649_v57 = vpop.f32.mrf.mxu3 }
  0xb8   : > { %704 = vst.msk [vmem:[#allocation2 + $0x8] sm:$0xff] %vm702_vm1, %v671_v54  ;;  %v626_v58 = vadd.f32 %v2222_v37, %v625_v56  ;;  %v650_v59 = vadd.f32 %v2222_v37, %v649_v57 }
  0xb9   : > { %712 = vst.msk [vmem:[#allocation2 + $0x48] sm:$0xff] %vm702_vm1, %v679_v55 }
  0xba   : > { %v687_v60 = vmax.f32 %v626_v58, 0.0  ;;  %v695_v61 = vmax.f32 %v650_v59, 0.0 }
  0xbb   : > { %v580_v62 = vpop.f32.mrf.mxu0  ;;  %v604_v63 = vpop.f32.mrf.mxu1 }
  0xbc   : > { %720 = vst.msk [vmem:[#allocation2 + $0x88] sm:$0xff] %vm702_vm1, %v687_v60  ;;  %v581_v0 = vadd.f32 %v2222_v37, %v580_v62  ;;  %v605_v1 = vadd.f32 %v2222_v37, %v604_v63 }
  0xbd   : > { %728 = vst.msk [vmem:[#allocation2 + $0xc8] sm:$0xff] %vm702_vm1, %v695_v61 }
  0xbe   : > { %v672_v2 = vmax.f32 %v581_v0, 0.0  ;;  %v680_v3 = vmax.f32 %v605_v1, 0.0 }
  0xbf   : > { %v628_v4 = vpop.f32.mrf.mxu2  ;;  %v652_v5 = vpop.f32.mrf.mxu3 }
  0xc0   : > { %705 = vst.msk [vmem:[#allocation2 + $0x10] sm:$0xff] %vm702_vm1, %v672_v2  ;;  %v629_v6 = vadd.f32 %v2222_v37, %v628_v4  ;;  %v653_v7 = vadd.f32 %v2222_v37, %v652_v5 }
  0xc1   : > { %713 = vst.msk [vmem:[#allocation2 + $0x50] sm:$0xff] %vm702_vm1, %v680_v3 }
  0xc2   : > { %v688_v8 = vmax.f32 %v629_v6, 0.0  ;;  %v696_v9 = vmax.f32 %v653_v7, 0.0 }
  0xc3   : > { %v583_v10 = vpop.f32.mrf.mxu0  ;;  %v607_v11 = vpop.f32.mrf.mxu1 }
  0xc4   : > { %721 = vst.msk [vmem:[#allocation2 + $0x90] sm:$0xff] %vm702_vm1, %v688_v8  ;;  %v584_v12 = vadd.f32 %v2222_v37, %v583_v10  ;;  %v608_v13 = vadd.f32 %v2222_v37, %v607_v11 }
  0xc5   : > { %729 = vst.msk [vmem:[#allocation2 + $0xd0] sm:$0xff] %vm702_vm1, %v696_v9 }
  0xc6   : > { %v673_v14 = vmax.f32 %v584_v12, 0.0  ;;  %v681_v15 = vmax.f32 %v608_v13, 0.0 }
  0xc7   : > { %v631_v16 = vpop.f32.mrf.mxu2  ;;  %v655_v17 = vpop.f32.mrf.mxu3 }
  0xc8   : > { %706 = vst.msk [vmem:[#allocation2 + $0x18] sm:$0xff] %vm702_vm1, %v673_v14  ;;  %v632_v18 = vadd.f32 %v2222_v37, %v631_v16  ;;  %v656_v19 = vadd.f32 %v2222_v37, %v655_v17 }
  0xc9   : > { %714 = vst.msk [vmem:[#allocation2 + $0x58] sm:$0xff] %vm702_vm1, %v681_v15 }
  0xca   : > { %v689_v20 = vmax.f32 %v632_v18, 0.0  ;;  %v697_v21 = vmax.f32 %v656_v19, 0.0 }
  0xcb   : > { %v586_v22 = vpop.f32.mrf.mxu0  ;;  %v610_v23 = vpop.f32.mrf.mxu1 }
  0xcc   : > { %722 = vst.msk [vmem:[#allocation2 + $0x98] sm:$0xff] %vm702_vm1, %v689_v20  ;;  %v587_v24 = vadd.f32 %v2222_v37, %v586_v22  ;;  %v611_v25 = vadd.f32 %v2222_v37, %v610_v23 }
  0xcd   : > { %730 = vst.msk [vmem:[#allocation2 + $0xd8] sm:$0xff] %vm702_vm1, %v697_v21 }
  0xce   : > { %v674_v26 = vmax.f32 %v587_v24, 0.0  ;;  %v682_v27 = vmax.f32 %v611_v25, 0.0 }
  0xcf   : > { %v634_v28 = vpop.f32.mrf.mxu2  ;;  %v658_v29 = vpop.f32.mrf.mxu3 }
  0xd0   : > { %707 = vst.msk [vmem:[#allocation2 + $0x20] sm:$0xff] %vm702_vm1, %v674_v26  ;;  %v635_v30 = vadd.f32 %v2222_v37, %v634_v28  ;;  %v659_v31 = vadd.f32 %v2222_v37, %v658_v29 }
  0xd1   : > { %715 = vst.msk [vmem:[#allocation2 + $0x60] sm:$0xff] %vm702_vm1, %v682_v27 }
  0xd2   : > { %v690_v32 = vmax.f32 %v635_v30, 0.0  ;;  %v698_v33 = vmax.f32 %v659_v31, 0.0 }
  0xd3   : > { %v589_v34 = vpop.f32.mrf.mxu0  ;;  %v613_v35 = vpop.f32.mrf.mxu1 }
  0xd4   : > { %723 = vst.msk [vmem:[#allocation2 + $0xa0] sm:$0xff] %vm702_vm1, %v690_v32  ;;  %v590_v36 = vadd.f32 %v2222_v37, %v589_v34  ;;  %v614_v38 = vadd.f32 %v2222_v37, %v613_v35 }
  0xd5   : > { %731 = vst.msk [vmem:[#allocation2 + $0xe0] sm:$0xff] %vm702_vm1, %v698_v33 }
  0xd6   : > { %v675_v39 = vmax.f32 %v590_v36, 0.0  ;;  %v683_v40 = vmax.f32 %v614_v38, 0.0 }
  0xd7   : > { %v637_v41 = vpop.f32.mrf.mxu2  ;;  %v661_v42 = vpop.f32.mrf.mxu3 }
  0xd8   : > { %708 = vst.msk [vmem:[#allocation2 + $0x28] sm:$0xff] %vm702_vm1, %v675_v39  ;;  %v638_v43 = vadd.f32 %v2222_v37, %v637_v41  ;;  %v662_v44 = vadd.f32 %v2222_v37, %v661_v42 }
  0xd9   : > { %716 = vst.msk [vmem:[#allocation2 + $0x68] sm:$0xff] %vm702_vm1, %v683_v40 }
  0xda   : > { %v691_v45 = vmax.f32 %v638_v43, 0.0  ;;  %v699_v46 = vmax.f32 %v662_v44, 0.0 }
  0xdb   : > { %v592_v47 = vpop.f32.mrf.mxu0  ;;  %v616_v48 = vpop.f32.mrf.mxu1 }
  0xdc   : > { %724 = vst.msk [vmem:[#allocation2 + $0xa8] sm:$0xff] %vm702_vm1, %v691_v45  ;;  %v593_v49 = vadd.f32 %v2222_v37, %v592_v47  ;;  %v617_v50 = vadd.f32 %v2222_v37, %v616_v48 }
  0xdd   : > { %732 = vst.msk [vmem:[#allocation2 + $0xe8] sm:$0xff] %vm702_vm1, %v699_v46 }
  0xde   : > { %v676_v51 = vmax.f32 %v593_v49, 0.0  ;;  %v684_v52 = vmax.f32 %v617_v50, 0.0 }
  0xdf   : > { %v640_v53 = vpop.f32.mrf.mxu2  ;;  %v664_v54 = vpop.f32.mrf.mxu3 }
  0xe0   : > { %709 = vst.msk [vmem:[#allocation2 + $0x30] sm:$0xff] %vm702_vm1, %v676_v51  ;;  %v641_v55 = vadd.f32 %v2222_v37, %v640_v53  ;;  %v665_v56 = vadd.f32 %v2222_v37, %v664_v54 }
  0xe1   : > { %717 = vst.msk [vmem:[#allocation2 + $0x70] sm:$0xff] %vm702_vm1, %v684_v52 }
  0xe2   : > { %v692_v57 = vmax.f32 %v641_v55, 0.0  ;;  %v700_v58 = vmax.f32 %v665_v56, 0.0 }
  0xe3   : > { %v595_v59 = vpop.f32.mrf.mxu0  ;;  %v619_v60 = vpop.f32.mrf.mxu1 }
  0xe4   : > { %725 = vst.msk [vmem:[#allocation2 + $0xb0] sm:$0xff] %vm702_vm1, %v692_v57  ;;  %v596_v61 = vadd.f32 %v2222_v37, %v595_v59  ;;  %v620_v62 = vadd.f32 %v2222_v37, %v619_v60 }
  0xe5   : > { %733 = vst.msk [vmem:[#allocation2 + $0xf0] sm:$0xff] %vm702_vm1, %v700_v58 }
  0xe6   : > { %v677_v63 = vmax.f32 %v596_v61, 0.0  ;;  %v685_v0 = vmax.f32 %v620_v62, 0.0 }
  0xe7   : > { %v643_v1 = vpop.f32.mrf.mxu2  ;;  %v667_v2 = vpop.f32.mrf.mxu3 }
  0xe8   : > { %710 = vst.msk [vmem:[#allocation2 + $0x38] sm:$0xff] %vm702_vm1, %v677_v63  ;;  %v644_v3 = vadd.f32 %v2222_v37, %v643_v1  ;;  %v668_v4 = vadd.f32 %v2222_v37, %v667_v2 }
  0xe9   : > { %718 = vst.msk [vmem:[#allocation2 + $0x78] sm:$0xff] %vm702_vm1, %v685_v0 }
  0xea   : > { %v693_v5 = vmax.f32 %v644_v3, 0.0  ;;  %v701_v6 = vmax.f32 %v668_v4, 0.0 }
  0xec   : > { %726 = vst.msk [vmem:[#allocation2 + $0xb8] sm:$0xff] %vm702_vm1, %v693_v5 }
  0xed   : > { %734 = vst.msk [vmem:[#allocation2 + $0xf8] sm:$0xff] %vm702_vm1, %v701_v6 }
  0xee PF: > { %v774_v7 = vld [vmem:[%s2126_s27 + $0x38] sm:$0xff]  ;;  %v773_v8 = vld [vmem:[%s2126_s27 + $0x30] sm:$0xff]  ;;  %v772_v37 = vld [vmem:[%s2126_s27 + $0x28] sm:$0xff]  ;;  %vm779_vm2 = vcmask 523264   ;;  %p1739_p1 = scmp.ne.s32.totalorder %s1966_s14, 3 }
  0xef   : > { %1792 = vmatpush.msra.mxu2 %v774_v7  ;;  %884 = vmatpush.msra.mxu0 %v774_v7  ;;  %v771_v9 = vld [vmem:[%s2126_s27 + $0x20] sm:$0xff]  ;;  %v770_v10 = vld [vmem:[%s2126_s27 + $0x18] sm:$0xff]  ;;  %v769_v11 = vld [vmem:[%s2126_s27 + $0x10] sm:$0xff] }
  0xf0   : > { %v768_v12 = vld [vmem:[%s2126_s27 + $0x8] sm:$0xff]  ;;  %v767_v13 = vld [vmem:[%s2126_s27] sm:$0xff]  ;;  %v2312_v18 = vld [vmem:[#allocation2 + $0x90] sm:$0xff] }
  0xf1   : > { %1793 = vmatpush.msra.mxu2 %v773_v8  ;;  %885 = vmatpush.msra.mxu0 %v773_v8  ;;  %v2296_v14 = vld [vmem:[#allocation2 + $0x80] sm:$0xff]  ;;  %v2304_v16 = vld [vmem:[#allocation2 + $0x88] sm:$0xff]  ;;  %v2314_v19 = vld [vmem:[#allocation2 + $0x10] sm:$0xff] }
  0xf2   : > { %v2298_v15 = vld [vmem:[#allocation2] sm:$0xff]  ;;  %v2306_v17 = vld [vmem:[#allocation2 + $0x8] sm:$0xff]  ;;  %v2320_v20 = vld [vmem:[#allocation2 + $0x98] sm:$0xff] }
  0xf3   : > { %1794 = vmatpush.msra.mxu2 %v772_v37  ;;  %886 = vmatpush.msra.mxu0 %v772_v37  ;;  %v2322_v21 = vld [vmem:[#allocation2 + $0x18] sm:$0xff]  ;;  %v2328_v22 = vld [vmem:[#allocation2 + $0xa0] sm:$0xff]  ;;  %v2336_v24 = vld [vmem:[#allocation2 + $0xa8] sm:$0xff] }
  0xf4   : > { %v2330_v23 = vld [vmem:[#allocation2 + $0x20] sm:$0xff]  ;;  %v2338_v25 = vld [vmem:[#allocation2 + $0x28] sm:$0xff]  ;;  %v2344_v26 = vld [vmem:[#allocation2 + $0xb0] sm:$0xff] }
  0xf5   : > { %1795 = vmatpush.msra.mxu2 %v771_v9  ;;  %887 = vmatpush.msra.mxu0 %v771_v9  ;;  %v2346_v27 = vld [vmem:[#allocation2 + $0x30] sm:$0xff]  ;;  %v2352_v28 = vld [vmem:[#allocation2 + $0xb8] sm:$0xff]  ;;  %v2360_v30 = vld [vmem:[#allocation2 + $0xc0] sm:$0xff] }
  0xf6   : > { %v2354_v29 = vld [vmem:[#allocation2 + $0x38] sm:$0xff]  ;;  %v2362_v31 = vld [vmem:[#allocation2 + $0x40] sm:$0xff]  ;;  %v2368_v32 = vld [vmem:[#allocation2 + $0xc8] sm:$0xff] }
  0xf7   : > { %1796 = vmatpush.msra.mxu2 %v770_v10  ;;  %888 = vmatpush.msra.mxu0 %v770_v10  ;;  %v2370_v33 = vld [vmem:[#allocation2 + $0x48] sm:$0xff]  ;;  %v2376_v34 = vld [vmem:[#allocation2 + $0xd0] sm:$0xff]  ;;  %v2384_v36 = vld [vmem:[#allocation2 + $0xd8] sm:$0xff] }
  0xf8   : > { %v2378_v35 = vld [vmem:[#allocation2 + $0x50] sm:$0xff]  ;;  %v2386_v38 = vld [vmem:[#allocation2 + $0x58] sm:$0xff]  ;;  %v1026_v41 = vld [vmem:[%s2135_s11 + $0x28] sm:$0xff] }
  0xf9   : > { %1797 = vmatpush.msra.mxu2 %v769_v11  ;;  %889 = vmatpush.msra.mxu0 %v769_v11  ;;  %v1028_v39 = vld [vmem:[%s2135_s11 + $0x38] sm:$0xff]  ;;  %v1027_v40 = vld [vmem:[%s2135_s11 + $0x30] sm:$0xff]  ;;  %v1025_v42 = vld [vmem:[%s2135_s11 + $0x20] sm:$0xff] }
  0xfa   : > { %1800 = vmatpush.msra.mxu3 %v1028_v39  ;;  %1133 = vmatpush.msra.mxu1 %v1028_v39  ;;  %v2396_v43 = vld [vmem:[#allocation2 + $0xe0] sm:$0xff]  ;;  %v1024_v45 = vld [vmem:[%s2135_s11 + $0x18] sm:$0xff]  ;;  %v1023_v46 = vld [vmem:[%s2135_s11 + $0x10] sm:$0xff] }
  0xfb   : > { %1798 = vmatpush.msra.mxu2 %v768_v12  ;;  %890 = vmatpush.msra.mxu0 %v768_v12  ;;  %v2398_v44 = vld [vmem:[#allocation2 + $0x60] sm:$0xff]  ;;  %v1022_v47 = vld [vmem:[%s2135_s11 + $0x8] sm:$0xff]  ;;  %v2416_v51 = vld [vmem:[#allocation2 + $0xf0] sm:$0xff] }
  0xfc   : > { %1801 = vmatpush.msra.mxu3 %v1027_v40  ;;  %1134 = vmatpush.msra.mxu1 %v1027_v40  ;;  %v2407_v48 = vld [vmem:[#allocation2 + $0xe8] sm:$0xff]  ;;  %v1021_v50 = vld [vmem:[%s2135_s11] sm:$0xff]  ;;  %v2418_v52 = vld [vmem:[#allocation2 + $0x70] sm:$0xff] }
  0xfd   : > { %1799 = vmatpush.msra.mxu2 %v767_v13  ;;  %891 = vmatpush.msra.mxu0 %v767_v13  ;;  %v2409_v49 = vld [vmem:[#allocation2 + $0x68] sm:$0xff]  ;;  %v2424_v53 = vld [vmem:[#allocation2 + $0xf8] sm:$0xff]  ;;  %v2437_v55 = vld [vmem:[%s406_s26] ss:$0 sm:$0xff] }
  0xfe   : > { %1691 = vmatmul.msk.f32.vlgmr.msra.gmra.mxu2 %vm779_vm2, %v2296_v14  ;;  %1675 = vmatmul.msk.f32.vlgmr.msra.gmra.mxu0 %vm779_vm2, %v2298_v15  ;;  %v2426_v54 = vld [vmem:[#allocation2 + $0x78] sm:$0xff] }
  0xff   : > { %1802 = vmatpush.msra.mxu3 %v1026_v41  ;;  %1135 = vmatpush.msra.mxu1 %v1026_v41 }
 0x101   : > { %1803 = vmatpush.msra.mxu3 %v1025_v42  ;;  %1136 = vmatpush.msra.mxu1 %v1025_v42 }
 0x103   : > { %1804 = vmatpush.msra.mxu3 %v1024_v45  ;;  %1137 = vmatpush.msra.mxu1 %v1024_v45 }
 0x105   : > { %1805 = vmatpush.msra.mxu3 %v1023_v46  ;;  %1138 = vmatpush.msra.mxu1 %v1023_v46 }
 0x106   : > { %1692 = vmatmul.msk.f32.gmra.mxu2 %vm779_vm2, %v2304_v16  ;;  %1676 = vmatmul.msk.f32.gmra.mxu0 %vm779_vm2, %v2306_v17 }
 0x107   : > { %1806 = vmatpush.msra.mxu3 %v1022_v47  ;;  %1139 = vmatpush.msra.mxu1 %v1022_v47 }
 0x109   : > { %1807 = vmatpush.msra.mxu3 %v1021_v50  ;;  %1140 = vmatpush.msra.mxu1 %v1021_v50 }
 0x10e   : > { %1693 = vmatmul.msk.f32.gmra.mxu2 %vm779_vm2, %v2312_v18  ;;  %1677 = vmatmul.msk.f32.gmra.mxu0 %vm779_vm2, %v2314_v19 }
 0x116   : > { %1694 = vmatmul.msk.f32.gmra.mxu2 %vm779_vm2, %v2320_v20  ;;  %1678 = vmatmul.msk.f32.gmra.mxu0 %vm779_vm2, %v2322_v21 }
 0x11e   : > { %1695 = vmatmul.msk.f32.gmra.mxu2 %vm779_vm2, %v2328_v22  ;;  %1679 = vmatmul.msk.f32.gmra.mxu0 %vm779_vm2, %v2330_v23 }
 0x126   : > { %1696 = vmatmul.msk.f32.gmra.mxu2 %vm779_vm2, %v2336_v24  ;;  %1680 = vmatmul.msk.f32.gmra.mxu0 %vm779_vm2, %v2338_v25 }
 0x12e   : > { %1697 = vmatmul.msk.f32.gmra.mxu2 %vm779_vm2, %v2344_v26  ;;  %1681 = vmatmul.msk.f32.gmra.mxu0 %vm779_vm2, %v2346_v27 }
 0x136   : > { %1698 = vmatmul.msk.f32.gmra.mxu2 %vm779_vm2, %v2352_v28  ;;  %1682 = vmatmul.msk.f32.gmra.mxu0 %vm779_vm2, %v2354_v29 }
 0x13e   : > { %1699 = vmatmul.msk.f32.gmra.mxu2 %vm779_vm2, %v2360_v30  ;;  %1683 = vmatmul.msk.f32.gmra.mxu0 %vm779_vm2, %v2362_v31 }
 0x146   : > { %1700 = vmatmul.msk.f32.gmra.mxu2 %vm779_vm2, %v2368_v32  ;;  %1684 = vmatmul.msk.f32.gmra.mxu0 %vm779_vm2, %v2370_v33 }
 0x14e   : > { %1701 = vmatmul.msk.f32.gmra.mxu2 %vm779_vm2, %v2376_v34  ;;  %1685 = vmatmul.msk.f32.gmra.mxu0 %vm779_vm2, %v2378_v35 }
 0x156   : > { %1702 = vmatmul.msk.f32.gmra.mxu2 %vm779_vm2, %v2384_v36  ;;  %1686 = vmatmul.msk.f32.gmra.mxu0 %vm779_vm2, %v2386_v38 }
 0x15e   : > { %1703 = vmatmul.msk.f32.gmra.mxu2 %vm779_vm2, %v2396_v43  ;;  %1687 = vmatmul.msk.f32.gmra.mxu0 %vm779_vm2, %v2398_v44 }
 0x166   : > { %1704 = vmatmul.msk.f32.gmra.mxu2 %vm779_vm2, %v2407_v48  ;;  %1688 = vmatmul.msk.f32.gmra.mxu0 %vm779_vm2, %v2409_v49 }
 0x16e   : > { %1705 = vmatmul.msk.f32.gmra.mxu2 %vm779_vm2, %v2416_v51  ;;  %1689 = vmatmul.msk.f32.gmra.mxu0 %vm779_vm2, %v2418_v52 }
 0x176   : > { %1706 = vmatmul.msk.f32.gmra.mxu2 %vm779_vm2, %v2424_v53  ;;  %1690 = vmatmul.msk.f32.gmra.mxu0 %vm779_vm2, %v2426_v54 }
 0x17b   : > { %v893_v56 = vpop.f32.mrf.mxu0 }
 0x17c   : > { %v894_v57 = vadd.f32 %v2437_v55, %v893_v56 }
 0x17e   : > { %v989_v58 = vmax.f32 %v894_v57, 0.0 }
 0x180   : > { %1707 = vmatmul.msk.f32.vlgmr.msra.gmra.mxu1 %vm779_vm2, %v989_v58 }
 0x181   : > { %v941_v59 = vpop.f32.mrf.mxu2 }
 0x182   : > { %v942_v60 = vadd.f32 %v2437_v55, %v941_v59 }
 0x183   : > { %v896_v61 = vpop.f32.mrf.mxu0 }
 0x184   : > { %v1005_v62 = vmax.f32 %v942_v60, 0.0  ;;  %v897_v63 = vadd.f32 %v2437_v55, %v896_v61 }
 0x186   : > { %1723 = vmatmul.msk.f32.vlgmr.msra.gmra.mxu3 %vm779_vm2, %v1005_v62  ;;  %v990_v0 = vmax.f32 %v897_v63, 0.0 }
 0x188   : > { %1708 = vmatmul.msk.f32.gmra.mxu1 %vm779_vm2, %v990_v0 }
 0x189   : > { %v944_v1 = vpop.f32.mrf.mxu2 }
 0x18a   : > { %v945_v2 = vadd.f32 %v2437_v55, %v944_v1 }
 0x18b   : > { %v899_v3 = vpop.f32.mrf.mxu0 }
 0x18c   : > { %v1006_v4 = vmax.f32 %v945_v2, 0.0  ;;  %v900_v5 = vadd.f32 %v2437_v55, %v899_v3 }
 0x18e   : > { %1724 = vmatmul.msk.f32.gmra.mxu3 %vm779_vm2, %v1006_v4  ;;  %v991_v6 = vmax.f32 %v900_v5, 0.0 }
 0x190   : > { %1709 = vmatmul.msk.f32.gmra.mxu1 %vm779_vm2, %v991_v6 }
 0x191   : > { %v947_v7 = vpop.f32.mrf.mxu2 }
 0x192   : > { %v948_v8 = vadd.f32 %v2437_v55, %v947_v7 }
 0x193   : > { %v902_v37 = vpop.f32.mrf.mxu0 }
 0x194   : > { %v1007_v9 = vmax.f32 %v948_v8, 0.0  ;;  %v903_v10 = vadd.f32 %v2437_v55, %v902_v37 }
 0x196   : > { %1725 = vmatmul.msk.f32.gmra.mxu3 %vm779_vm2, %v1007_v9  ;;  %v992_v11 = vmax.f32 %v903_v10, 0.0 }
 0x198   : > { %1710 = vmatmul.msk.f32.gmra.mxu1 %vm779_vm2, %v992_v11 }
 0x199   : > { %v950_v12 = vpop.f32.mrf.mxu2 }
 0x19a   : > { %v951_v13 = vadd.f32 %v2437_v55, %v950_v12 }
 0x19b   : > { %v905_v39 = vpop.f32.mrf.mxu0 }
 0x19c   : > { %v1008_v40 = vmax.f32 %v951_v13, 0.0  ;;  %v906_v41 = vadd.f32 %v2437_v55, %v905_v39 }
 0x19e   : > { %1726 = vmatmul.msk.f32.gmra.mxu3 %vm779_vm2, %v1008_v40  ;;  %v993_v42 = vmax.f32 %v906_v41, 0.0 }
 0x1a0   : > { %1711 = vmatmul.msk.f32.gmra.mxu1 %vm779_vm2, %v993_v42 }
 0x1a1   : > { %v953_v45 = vpop.f32.mrf.mxu2 }
 0x1a2   : > { %v954_v46 = vadd.f32 %v2437_v55, %v953_v45 }
 0x1a3   : > { %v908_v47 = vpop.f32.mrf.mxu0 }
 0x1a4   : > { %v1009_v50 = vmax.f32 %v954_v46, 0.0  ;;  %v909_v56 = vadd.f32 %v2437_v55, %v908_v47 }
 0x1a6   : > { %1727 = vmatmul.msk.f32.gmra.mxu3 %vm779_vm2, %v1009_v50  ;;  %v994_v57 = vmax.f32 %v909_v56, 0.0 }
 0x1a8   : > { %1712 = vmatmul.msk.f32.gmra.mxu1 %vm779_vm2, %v994_v57 }
 0x1a9   : > { %v956_v58 = vpop.f32.mrf.mxu2 }
 0x1aa   : > { %v957_v59 = vadd.f32 %v2437_v55, %v956_v58 }
 0x1ab   : > { %v911_v60 = vpop.f32.mrf.mxu0 }
 0x1ac   : > { %v1010_v61 = vmax.f32 %v957_v59, 0.0  ;;  %v912_v62 = vadd.f32 %v2437_v55, %v911_v60 }
 0x1ae   : > { %1728 = vmatmul.msk.f32.gmra.mxu3 %vm779_vm2, %v1010_v61  ;;  %v995_v63 = vmax.f32 %v912_v62, 0.0 }
 0x1b0   : > { %1713 = vmatmul.msk.f32.gmra.mxu1 %vm779_vm2, %v995_v63 }
 0x1b1   : > { %v959_v0 = vpop.f32.mrf.mxu2 }
 0x1b2   : > { %v960_v1 = vadd.f32 %v2437_v55, %v959_v0 }
 0x1b3   : > { %v914_v2 = vpop.f32.mrf.mxu0 }
 0x1b4   : > { %v1011_v3 = vmax.f32 %v960_v1, 0.0  ;;  %v915_v4 = vadd.f32 %v2437_v55, %v914_v2 }
 0x1b6   : > { %1729 = vmatmul.msk.f32.gmra.mxu3 %vm779_vm2, %v1011_v3  ;;  %v996_v5 = vmax.f32 %v915_v4, 0.0 }
 0x1b8   : > { %1714 = vmatmul.msk.f32.gmra.mxu1 %vm779_vm2, %v996_v5 }
 0x1b9   : > { %v962_v6 = vpop.f32.mrf.mxu2 }
 0x1ba   : > { %v963_v7 = vadd.f32 %v2437_v55, %v962_v6 }
 0x1bb   : > { %v917_v8 = vpop.f32.mrf.mxu0 }
 0x1bc   : > { %v1012_v37 = vmax.f32 %v963_v7, 0.0  ;;  %v918_v9 = vadd.f32 %v2437_v55, %v917_v8 }
 0x1be   : > { %1730 = vmatmul.msk.f32.gmra.mxu3 %vm779_vm2, %v1012_v37  ;;  %v997_v10 = vmax.f32 %v918_v9, 0.0 }
 0x1c0   : > { %1715 = vmatmul.msk.f32.gmra.mxu1 %vm779_vm2, %v997_v10 }
 0x1c1   : > { %v965_v11 = vpop.f32.mrf.mxu2 }
 0x1c2   : > { %v966_v12 = vadd.f32 %v2437_v55, %v965_v11 }
 0x1c3   : > { %v920_v13 = vpop.f32.mrf.mxu0 }
 0x1c4   : > { %v1013_v39 = vmax.f32 %v966_v12, 0.0  ;;  %v921_v40 = vadd.f32 %v2437_v55, %v920_v13 }
 0x1c6   : > { %1731 = vmatmul.msk.f32.gmra.mxu3 %vm779_vm2, %v1013_v39  ;;  %v998_v41 = vmax.f32 %v921_v40, 0.0 }
 0x1c8   : > { %1716 = vmatmul.msk.f32.gmra.mxu1 %vm779_vm2, %v998_v41 }
 0x1c9   : > { %v968_v42 = vpop.f32.mrf.mxu2 }
 0x1ca   : > { %v969_v45 = vadd.f32 %v2437_v55, %v968_v42 }
 0x1cb   : > { %v923_v46 = vpop.f32.mrf.mxu0 }
 0x1cc   : > { %v1014_v47 = vmax.f32 %v969_v45, 0.0  ;;  %v924_v50 = vadd.f32 %v2437_v55, %v923_v46 }
 0x1ce   : > { %1732 = vmatmul.msk.f32.gmra.mxu3 %vm779_vm2, %v1014_v47  ;;  %v999_v56 = vmax.f32 %v924_v50, 0.0 }
 0x1d0   : > { %1717 = vmatmul.msk.f32.gmra.mxu1 %vm779_vm2, %v999_v56 }
 0x1d1   : > { %v971_v57 = vpop.f32.mrf.mxu2 }
 0x1d2   : > { %v972_v58 = vadd.f32 %v2437_v55, %v971_v57 }
 0x1d3   : > { %v926_v59 = vpop.f32.mrf.mxu0 }
 0x1d4   : > { %v1015_v60 = vmax.f32 %v972_v58, 0.0  ;;  %v927_v61 = vadd.f32 %v2437_v55, %v926_v59  ;;  %v2507_v59 = vld [vmem:[%s414_s10] ss:$0 sm:$0xff] }
 0x1d6   : > { %1733 = vmatmul.msk.f32.gmra.mxu3 %vm779_vm2, %v1015_v60  ;;  %v1000_v62 = vmax.f32 %v927_v61, 0.0 }
 0x1d8   : > { %1718 = vmatmul.msk.f32.gmra.mxu1 %vm779_vm2, %v1000_v62 }
 0x1d9   : > { %v974_v63 = vpop.f32.mrf.mxu2 }
 0x1da   : > { %v975_v0 = vadd.f32 %v2437_v55, %v974_v63 }
 0x1db   : > { %v929_v1 = vpop.f32.mrf.mxu0 }
 0x1dc   : > { %v1016_v2 = vmax.f32 %v975_v0, 0.0  ;;  %v930_v3 = vadd.f32 %v2437_v55, %v929_v1 }
 0x1de   : > { %1734 = vmatmul.msk.f32.gmra.mxu3 %vm779_vm2, %v1016_v2  ;;  %v1001_v4 = vmax.f32 %v930_v3, 0.0 }
 0x1e0   : > { %1719 = vmatmul.msk.f32.gmra.mxu1 %vm779_vm2, %v1001_v4 }
 0x1e1   : > { %v977_v5 = vpop.f32.mrf.mxu2 }
 0x1e2   : > { %v978_v6 = vadd.f32 %v2437_v55, %v977_v5 }
 0x1e3   : > { %v932_v7 = vpop.f32.mrf.mxu0 }
 0x1e4   : > { %v1017_v8 = vmax.f32 %v978_v6, 0.0  ;;  %v933_v37 = vadd.f32 %v2437_v55, %v932_v7 }
 0x1e6   : > { %1735 = vmatmul.msk.f32.gmra.mxu3 %vm779_vm2, %v1017_v8  ;;  %v1002_v9 = vmax.f32 %v933_v37, 0.0 }
 0x1e8   : > { %1720 = vmatmul.msk.f32.gmra.mxu1 %vm779_vm2, %v1002_v9 }
 0x1e9   : > { %v980_v10 = vpop.f32.mrf.mxu2 }
 0x1ea   : > { %v981_v11 = vadd.f32 %v2437_v55, %v980_v10 }
 0x1eb   : > { %v935_v12 = vpop.f32.mrf.mxu0 }
 0x1ec   : > { %v1018_v13 = vmax.f32 %v981_v11, 0.0  ;;  %v936_v39 = vadd.f32 %v2437_v55, %v935_v12 }
 0x1ee   : > { %1736 = vmatmul.msk.f32.gmra.mxu3 %vm779_vm2, %v1018_v13  ;;  %v1003_v40 = vmax.f32 %v936_v39, 0.0 }
 0x1f0   : > { %1721 = vmatmul.msk.f32.gmra.mxu1 %vm779_vm2, %v1003_v40 }
 0x1f1   : > { %v983_v41 = vpop.f32.mrf.mxu2 }
 0x1f2   : > { %v984_v42 = vadd.f32 %v2437_v55, %v983_v41 }
 0x1f3   : > { %v938_v45 = vpop.f32.mrf.mxu0 }
 0x1f4   : > { %v1019_v46 = vmax.f32 %v984_v42, 0.0  ;;  %v939_v47 = vadd.f32 %v2437_v55, %v938_v45 }
 0x1f6   : > { %1737 = vmatmul.msk.f32.gmra.mxu3 %vm779_vm2, %v1019_v46  ;;  %v1004_v50 = vmax.f32 %v939_v47, 0.0 }
 0x1f8   : > { %1722 = vmatmul.msk.f32.gmra.mxu1 %vm779_vm2, %v1004_v50 }
 0x1f9   : > { %v986_v56 = vpop.f32.mrf.mxu2 }
 0x1fa   : > { %v987_v57 = vadd.f32 %v2437_v55, %v986_v56 }
 0x1fc   : > { %v1020_v58 = vmax.f32 %v987_v57, 0.0 }
 0x1fd   : > { %v1142_v60 = vpop.f32.mrf.mxu1 }
 0x1fe   : > { %1738 = vmatmul.msk.f32.gmra.mxu3 %vm779_vm2, %v1020_v58  ;;  %v1238_v61 = vadd.f32 %v1142_v60, %v2298_v15 }
 0x200   : > { %v2512_v62 = vadd.f32 %v2507_v59, %v1238_v61 }
 0x202   : > { %1306 = vst.msk [vmem:[#allocation2] sm:$0xff] %vm779_vm2, %v2512_v62 }
 0x205   : > { %v1145_v63 = vpop.f32.mrf.mxu1 }
 0x206   : > { %v1239_v55 = vadd.f32 %v1145_v63, %v2306_v17 }
 0x208   : > { %v2518_v0 = vadd.f32 %v2507_v59, %v1239_v55 }
 0x209   : > { %v1190_v1 = vpop.f32.mrf.mxu3 }
 0x20a   : > { %v1254_v2 = vadd.f32 %v1190_v1, %v2296_v14  ;;  %1307 = vst.msk [vmem:[#allocation2 + $0x8] sm:$0xff] %vm779_vm2, %v2518_v0 }
 0x20c   : > { %v2524_v15 = vadd.f32 %v2507_v59, %v1254_v2 }
 0x20d   : > { %v1148_v3 = vpop.f32.mrf.mxu1 }
 0x20e   : > { %1322 = vst.msk [vmem:[#allocation2 + $0x80] sm:$0xff] %vm779_vm2, %v2524_v15  ;;  %v1240_v4 = vadd.f32 %v1148_v3, %v2314_v19 }
 0x210   : > { %v2530_v17 = vadd.f32 %v2507_v59, %v1240_v4 }
 0x211   : > { %v1193_v5 = vpop.f32.mrf.mxu3 }
 0x212   : > { %v1255_v6 = vadd.f32 %v1193_v5, %v2304_v16  ;;  %1308 = vst.msk [vmem:[#allocation2 + $0x10] sm:$0xff] %vm779_vm2, %v2530_v17 }
 0x214   : > { %v2536_v14 = vadd.f32 %v2507_v59, %v1255_v6 }
 0x215   : > { %v1151_v7 = vpop.f32.mrf.mxu1 }
 0x216   : > { %1323 = vst.msk [vmem:[#allocation2 + $0x88] sm:$0xff] %vm779_vm2, %v2536_v14  ;;  %v1241_v8 = vadd.f32 %v1151_v7, %v2322_v21 }
 0x218   : > { %v2542_v19 = vadd.f32 %v2507_v59, %v1241_v8 }
 0x219   : > { %v1196_v37 = vpop.f32.mrf.mxu3 }
 0x21a   : > { %v1256_v9 = vadd.f32 %v1196_v37, %v2312_v18  ;;  %1309 = vst.msk [vmem:[#allocation2 + $0x18] sm:$0xff] %vm779_vm2, %v2542_v19 }
 0x21c   : > { %v2548_v16 = vadd.f32 %v2507_v59, %v1256_v9 }
 0x21d   : > { %v1154_v10 = vpop.f32.mrf.mxu1 }
 0x21e   : > { %1324 = vst.msk [vmem:[#allocation2 + $0x90] sm:$0xff] %vm779_vm2, %v2548_v16  ;;  %v1242_v11 = vadd.f32 %v1154_v10, %v2330_v23 }
 0x220   : > { %v2554_v21 = vadd.f32 %v2507_v59, %v1242_v11 }
 0x221   : > { %v1199_v12 = vpop.f32.mrf.mxu3 }
 0x222   : > { %v1257_v13 = vadd.f32 %v1199_v12, %v2320_v20  ;;  %1310 = vst.msk [vmem:[#allocation2 + $0x20] sm:$0xff] %vm779_vm2, %v2554_v21 }
 0x224   : > { %v2560_v18 = vadd.f32 %v2507_v59, %v1257_v13 }
 0x225   : > { %v1157_v39 = vpop.f32.mrf.mxu1 }
 0x226   : > { %1325 = vst.msk [vmem:[#allocation2 + $0x98] sm:$0xff] %vm779_vm2, %v2560_v18  ;;  %v1243_v40 = vadd.f32 %v1157_v39, %v2338_v25 }
 0x228   : > { %v2566_v23 = vadd.f32 %v2507_v59, %v1243_v40 }
 0x229   : > { %v1202_v41 = vpop.f32.mrf.mxu3 }
 0x22a   : > { %v1258_v42 = vadd.f32 %v1202_v41, %v2328_v22  ;;  %1311 = vst.msk [vmem:[#allocation2 + $0x28] sm:$0xff] %vm779_vm2, %v2566_v23 }
 0x22c   : > { %v2572_v20 = vadd.f32 %v2507_v59, %v1258_v42 }
 0x22d   : > { %v1160_v45 = vpop.f32.mrf.mxu1 }
 0x22e   : > { %1326 = vst.msk [vmem:[#allocation2 + $0xa0] sm:$0xff] %vm779_vm2, %v2572_v20  ;;  %v1244_v46 = vadd.f32 %v1160_v45, %v2346_v27 }
 0x230   : > { %v2578_v25 = vadd.f32 %v2507_v59, %v1244_v46 }
 0x231   : > { %v1205_v47 = vpop.f32.mrf.mxu3 }
 0x232   : > { %v1259_v50 = vadd.f32 %v1205_v47, %v2336_v24  ;;  %1312 = vst.msk [vmem:[#allocation2 + $0x30] sm:$0xff] %vm779_vm2, %v2578_v25 }
 0x234   : > { %v2584_v22 = vadd.f32 %v2507_v59, %v1259_v50 }
 0x235   : > { %v1163_v56 = vpop.f32.mrf.mxu1 }
 0x236   : > { %1327 = vst.msk [vmem:[#allocation2 + $0xa8] sm:$0xff] %vm779_vm2, %v2584_v22  ;;  %v1245_v57 = vadd.f32 %v1163_v56, %v2354_v29 }
 0x238   : > { %v2590_v27 = vadd.f32 %v2507_v59, %v1245_v57 }
 0x239   : > { %v1208_v58 = vpop.f32.mrf.mxu3 }
 0x23a   : > { %v1260_v60 = vadd.f32 %v1208_v58, %v2344_v26  ;;  %1313 = vst.msk [vmem:[#allocation2 + $0x38] sm:$0xff] %vm779_vm2, %v2590_v27 }
 0x23c   : > { %v2596_v24 = vadd.f32 %v2507_v59, %v1260_v60 }
 0x23d   : > { %v1166_v61 = vpop.f32.mrf.mxu1 }
 0x23e   : > { %1328 = vst.msk [vmem:[#allocation2 + $0xb0] sm:$0xff] %vm779_vm2, %v2596_v24  ;;  %v1246_v63 = vadd.f32 %v1166_v61, %v2362_v31 }
 0x240   : > { %v2602_v29 = vadd.f32 %v2507_v59, %v1246_v63 }
 0x241   : > { %v1211_v55 = vpop.f32.mrf.mxu3 }
 0x242   : > { %v1261_v1 = vadd.f32 %v1211_v55, %v2352_v28  ;;  %1314 = vst.msk [vmem:[#allocation2 + $0x40] sm:$0xff] %vm779_vm2, %v2602_v29 }
 0x244   : > { %v2608_v26 = vadd.f32 %v2507_v59, %v1261_v1 }
 0x245   : > { %v1169_v2 = vpop.f32.mrf.mxu1 }
 0x246   : > { %1329 = vst.msk [vmem:[#allocation2 + $0xb8] sm:$0xff] %vm779_vm2, %v2608_v26  ;;  %v1247_v3 = vadd.f32 %v1169_v2, %v2370_v33 }
 0x248   : > { %v2614_v31 = vadd.f32 %v2507_v59, %v1247_v3 }
 0x249   : > { %v1214_v4 = vpop.f32.mrf.mxu3 }
 0x24a   : > { %v1262_v5 = vadd.f32 %v1214_v4, %v2360_v30  ;;  %1315 = vst.msk [vmem:[#allocation2 + $0x48] sm:$0xff] %vm779_vm2, %v2614_v31 }
 0x24c   : > { %v2620_v28 = vadd.f32 %v2507_v59, %v1262_v5 }
 0x24d   : > { %v1172_v6 = vpop.f32.mrf.mxu1 }
 0x24e   : > { %1330 = vst.msk [vmem:[#allocation2 + $0xc0] sm:$0xff] %vm779_vm2, %v2620_v28  ;;  %v1248_v7 = vadd.f32 %v1172_v6, %v2378_v35 }
 0x250   : > { %v1284_v33 = vadd.f32 %v2507_v59, %v1248_v7 }
 0x251   : > { %v1217_v8 = vpop.f32.mrf.mxu3 }
 0x252   : > { %v1263_v37 = vadd.f32 %v1217_v8, %v2368_v32  ;;  %1316 = vst.msk [vmem:[#allocation2 + $0x50] sm:$0xff] %vm779_vm2, %v1284_v33 }
 0x254   : > { %v1299_v30 = vadd.f32 %v2507_v59, %v1263_v37 }
 0x255   : > { %v1175_v9 = vpop.f32.mrf.mxu1 }
 0x256   : > { %1331 = vst.msk [vmem:[#allocation2 + $0xc8] sm:$0xff] %vm779_vm2, %v1299_v30  ;;  %v1249_v10 = vadd.f32 %v1175_v9, %v2386_v38 }
 0x258   : > { %v1285_v11 = vadd.f32 %v2507_v59, %v1249_v10 }
 0x259   : > { %v1220_v12 = vpop.f32.mrf.mxu3 }
 0x25a   : > { %v1264_v13 = vadd.f32 %v1220_v12, %v2376_v34  ;;  %1317 = vst.msk [vmem:[#allocation2 + $0x58] sm:$0xff] %vm779_vm2, %v1285_v11 }
 0x25c   : > { %v1300_v35 = vadd.f32 %v2507_v59, %v1264_v13 }
 0x25d   : > { %v1178_v39 = vpop.f32.mrf.mxu1 }
 0x25e   : > { %1332 = vst.msk [vmem:[#allocation2 + $0xd0] sm:$0xff] %vm779_vm2, %v1300_v35  ;;  %v1250_v32 = vadd.f32 %v1178_v39, %v2398_v44 }
 0x260   : > { %v1286_v40 = vadd.f32 %v2507_v59, %v1250_v32 }
 0x261   : > { %v1223_v41 = vpop.f32.mrf.mxu3 }
 0x262   : > { %v1265_v42 = vadd.f32 %v1223_v41, %v2384_v36  ;;  %1318 = vst.msk [vmem:[#allocation2 + $0x60] sm:$0xff] %vm779_vm2, %v1286_v40 }
 0x264   : > { %v1301_v38 = vadd.f32 %v2507_v59, %v1265_v42 }
 0x265   : > { %v1181_v45 = vpop.f32.mrf.mxu1 }
 0x266   : > { %1333 = vst.msk [vmem:[#allocation2 + $0xd8] sm:$0xff] %vm779_vm2, %v1301_v38  ;;  %v1251_v34 = vadd.f32 %v1181_v45, %v2409_v49 }
 0x268   : > { %v1287_v46 = vadd.f32 %v2507_v59, %v1251_v34 }
 0x269   : > { %v1226_v47 = vpop.f32.mrf.mxu3 }
 0x26a   : > { %v1266_v50 = vadd.f32 %v1226_v47, %v2396_v43  ;;  %1319 = vst.msk [vmem:[#allocation2 + $0x68] sm:$0xff] %vm779_vm2, %v1287_v46 }
 0x26c   : > { %v1302_v44 = vadd.f32 %v2507_v59, %v1266_v50 }
 0x26d   : > { %v1184_v56 = vpop.f32.mrf.mxu1 }
 0x26e   : > { %1334 = vst.msk [vmem:[#allocation2 + $0xe0] sm:$0xff] %vm779_vm2, %v1302_v44  ;;  %v1252_v36 = vadd.f32 %v1184_v56, %v2418_v52 }
 0x270   : > { %v1288_v57 = vadd.f32 %v2507_v59, %v1252_v36 }
 0x271   : > { %v1229_v58 = vpop.f32.mrf.mxu3 }
 0x272   : > { %v1267_v60 = vadd.f32 %v1229_v58, %v2407_v48  ;;  %1320 = vst.msk [vmem:[#allocation2 + $0x70] sm:$0xff] %vm779_vm2, %v1288_v57 }
 0x274   : > { %v1303_v49 = vadd.f32 %v2507_v59, %v1267_v60 }
 0x275   : > { %v1187_v61 = vpop.f32.mrf.mxu1 }
 0x276   : > { %1335 = vst.msk [vmem:[#allocation2 + $0xe8] sm:$0xff] %vm779_vm2, %v1303_v49  ;;  %v1253_v43 = vadd.f32 %v1187_v61, %v2426_v54 }
 0x278   : > { %v1289_v63 = vadd.f32 %v2507_v59, %v1253_v43 }
 0x279   : > { %v1232_v55 = vpop.f32.mrf.mxu3 }
 0x27a   : > { %v1268_v1 = vadd.f32 %v1232_v55, %v2416_v51  ;;  %1321 = vst.msk [vmem:[#allocation2 + $0x78] sm:$0xff] %vm779_vm2, %v1289_v63 }
 0x27c   : > { %v1304_v52 = vadd.f32 %v2507_v59, %v1268_v1 }
 0x27e   : > { %1336 = vst.msk [vmem:[#allocation2 + $0xf0] sm:$0xff] %vm779_vm2, %v1304_v52 }
 0x281   : > { %v1235_v48 = vpop.f32.mrf.mxu3 }
 0x282   : > { %v1269_v2 = vadd.f32 %v1235_v48, %v2424_v53  ;;  %1341 = sbr.rel (%p1739_p1) target bundleno = 849 (0x351), region = 64 }
 0x284   : > { %v1305_v3 = vadd.f32 %v2507_v59, %v1269_v2 }
 0x286   : > { %1337 = vst.msk [vmem:[#allocation2 + $0xf8] sm:$0xff] %vm779_vm2, %v1305_v3 }
 0x287   : > { %1740 = vmatpush.xpose.msk.msra.mxu0 %vm779_vm2, %v1289_v63  ;;  %1757 = vmatpush.xpose.msk.msra.mxu1 %vm779_vm2, %v1305_v3  ;;  %v1343_v51 = vld [vmem:[#allocation3] sm:$0x1]  ;;  %v1984_v53 = vmov 0   ;;  %vm1494_vm3 = vcmask 1040384  }
 0x288   : > { %1883 = vset.pattern.permute.xlu0 %v1984_v53  ;;  %v1342_v54 = vld [vmem:[%s2775_s7] sm:$0x1] }
 0x289   : > { %1346 = vperm.xlu0 %1883, %v1343_v51  }
 0x28b   : > { %1741 = vmatpush.xpose.msk.msra.mxu0 %vm779_vm2, %v1288_v57  ;;  %1758 = vmatpush.xpose.msk.msra.mxu1 %vm779_vm2, %v1304_v52 }
 0x28f   : > { %1742 = vmatpush.xpose.msk.msra.mxu0 %vm779_vm2, %v1287_v46  ;;  %1759 = vmatpush.xpose.msk.msra.mxu1 %vm779_vm2, %v1303_v49 }
 0x293   : > { %1743 = vmatpush.xpose.msk.msra.mxu0 %vm779_vm2, %v1286_v40  ;;  %1760 = vmatpush.xpose.msk.msra.mxu1 %vm779_vm2, %v1302_v44 }
 0x297   : > { %1744 = vmatpush.xpose.msk.msra.mxu0 %vm779_vm2, %v1285_v11  ;;  %1761 = vmatpush.xpose.msk.msra.mxu1 %vm779_vm2, %v1301_v38 }
 0x29b   : > { %1745 = vmatpush.xpose.msk.msra.mxu0 %vm779_vm2, %v1284_v33  ;;  %1762 = vmatpush.xpose.msk.msra.mxu1 %vm779_vm2, %v1300_v35 }
 0x29f   : > { %1746 = vmatpush.xpose.msk.msra.mxu0 %vm779_vm2, %v2614_v31  ;;  %1763 = vmatpush.xpose.msk.msra.mxu1 %vm779_vm2, %v1299_v30 }
 0x2a3   : > { %1747 = vmatpush.xpose.msk.msra.mxu0 %vm779_vm2, %v2602_v29  ;;  %1764 = vmatpush.xpose.msk.msra.mxu1 %vm779_vm2, %v2620_v28 }
 0x2a7   : > { %1748 = vmatpush.xpose.msk.msra.mxu0 %vm779_vm2, %v2590_v27  ;;  %1765 = vmatpush.xpose.msk.msra.mxu1 %vm779_vm2, %v2608_v26 }
 0x2ab   : > { %1749 = vmatpush.xpose.msk.msra.mxu0 %vm779_vm2, %v2578_v25  ;;  %1766 = vmatpush.xpose.msk.msra.mxu1 %vm779_vm2, %v2596_v24 }
 0x2af   : > { %1750 = vmatpush.xpose.msk.msra.mxu0 %vm779_vm2, %v2566_v23  ;;  %1767 = vmatpush.xpose.msk.msra.mxu1 %vm779_vm2, %v2584_v22 }
 0x2b3   : > { %1751 = vmatpush.xpose.msk.msra.mxu0 %vm779_vm2, %v2554_v21  ;;  %1768 = vmatpush.xpose.msk.msra.mxu1 %vm779_vm2, %v2572_v20 }
 0x2b7   : > { %1752 = vmatpush.xpose.msk.msra.mxu0 %vm779_vm2, %v2542_v19  ;;  %1769 = vmatpush.xpose.msk.msra.mxu1 %vm779_vm2, %v2560_v18 }
 0x2bb   : > { %1753 = vmatpush.xpose.msk.msra.mxu0 %vm779_vm2, %v2530_v17  ;;  %1770 = vmatpush.xpose.msk.msra.mxu1 %vm779_vm2, %v2548_v16 }
 0x2bf   : > { %1754 = vmatpush.xpose.msk.msra.mxu0 %vm779_vm2, %v2518_v0  ;;  %1771 = vmatpush.xpose.msk.msra.mxu1 %vm779_vm2, %v2536_v14 }
 0x2c3   : > { %1755 = vmatpush.xpose.msk.msra.mxu0 %vm779_vm2, %v2512_v62  ;;  %1772 = vmatpush.xpose.msk.msra.mxu1 %vm779_vm2, %v2524_v15  ;;  %v1497_v62 = vlaneseq }
 0x2c5   : > { %vm1499_vm4 = vcmp.lt.s32.totalorder %v1497_v62, 256 }
 0x2c6   : > { %1756 = vmatmul.msk.f32.vlgmr.msra.gmra.mxu0 %vm779_vm2, %v1342_v54  ;;  %1773 = vmatmul.msk.f32.vlgmr.msra.gmra.mxu1 %vm779_vm2, %v1342_v54 }
 0x2fb   : > { %v1347_v59 = vpop.permute.xlu0 %1346 }
 0x2fc   : > { %v1349_v0 = vperm.slane %v1347_v59, 0 }
 0x343   : > { %v1466_v17 = vpop.f32.mrf.mxu0  ;;  %v1486_v19 = vpop.f32.mrf.mxu1 }
 0x344   : > { %v1487_v14 = vadd.f32 %v1486_v19, %v1349_v0  ;;  %v1467_v16 = vadd.f32 %v1466_v17, %v1349_v0 }
 0x346   : > { %1884 = vtanh.f32 %v1487_v14 }
 0x347   : > { %1886 = vtanh.f32 %v1467_v16 }
 0x34c   : > { %v1885_v21 = vpop.eup %1884 }
 0x34d   : > { %v1493_v15 = vrot.slane %v1885_v21, 7  ;;  %v1887_v18 = vpop.eup %1886 }
 0x34f   : > { %v1495_v23 = vsel %vm1494_vm3, %v1887_v18, %v1493_v15 }
 0x350   : > { %1501 = vst.msk [vmem:[%s392_s8] sm:$0x3] %vm1499_vm4, %v1495_v23 }
 0x351 PF: > { %s1775_s10 = sshll.u32 %s1970_s15, 1  ;;  %s1515_s17 = sshll.u32 %s392_s8, 4  ;;  %s1516_s17 = int_to_ptr.vmem [resolvable:$true] %s1515_s17 }
 0x352   : > { %s1513_s16 = scalar_lea.hbm %s2777_s9, %s1775_s10  ;;  %s2798_s23 = sand.u32 1, %s1958_s12  }
 0x353   : > { %s1517_s13 = sshll.u32 %s1513_s16, 4  ;;  %s1503_s18 = scalar_lea.sflag [#allocation5], %s2798_s23  ;;  %s1518_s13 = int_to_ptr.hbm [resolvable:$true] %s1517_s13 }
 0x354   : > { %s1902_s19 = sshra.s32 %s1518_s13, 4  ;;  %s1908_s11 = scalar_lea.hbm %s2777_s9, 4  ;;  %s1903_s19 = int_to_ptr.hbm [resolvable:$true] %s1902_s19 }
 0x355   : > { %s1904_s25 = scalar_lea.hbm %s1903_s19, 2  ;;  %p1909_p6 = scmp.lt.s32.totalorder %s1903_s19, %s2777_s9 }
 0x356   : > { %p1905_p2 = scmp.ne.s32.totalorder %s1903_s19, %s1904_s25  ;;  %p1910_p7 = scmp.lt.s32.totalorder %s1908_s11, %s1904_s25 }
 0x358   : > { %p1906_p4 = pnand %p1905_p2, %p2087_p3  ;;  %p1911_p8 = por %p1910_p7, %p1909_p6 }
 0x35a   : > { %p1907_p5 = pneg %p1906_p4 }
 0x35c   : > { %p1912_p10 = pnand %p1911_p8, %p1907_p5 }
 0x35e   : > { %1915 = shalt.err (!%p1912_p10)
}
 0x35f   : > { %1808 = dma.vmem_to_hbm [thread:$0]  (%p2087_p3), %s1516_s17, 32, %s1518_s13, %s1503_s18  }
 0x360 PF: > { %s2799_s29 = sld [smem:[#allocation11_spill]] }
 0x361   : > { %s2800_s8 = sld [smem:[#allocation7_spill]] }
 0x366   : > { %p1814_p11 = scmp.ge.s32.totalorder %s2799_s29, 2 }
 0x367   : > { %s1529_s14 = sand.u32 1, %s2800_s8  }
 0x368   : > { %p1811_p12 = pnand %p1814_p11, %p2097_p9  ;;  %s1530_s30 = scalar_lea.sflag [#allocation5], %s1529_s14 }
 0x36a   : > { %p1812_p13 = pneg %p1811_p12 }
 0x36c   : > { %1949 = dma.done.wait (%p1812_p13), %s1530_s30, 32  }
 0x36d   : > { %1951 = vsyncadd (%p1812_p13), %s1530_s30, 4294967264  ;;  %s24_s18 = sadd.s32 1, %s2799_s29   ;;  %s2802_s10 = sld [smem:[#allocation8_spill]] }
 0x36e   : > { %p21_p0 = scmp.ge.s32.totalorder %s24_s18, 10   ;;  %s2803_s13 = sld [smem:[#allocation15_spill]] }
 0x36f   : > { %s2804_s14 = sld [smem:[#allocation9_spill]]  ;;  %s2808_s11 = smov %s1958_s12 }
 0x370   : > { %s2805_s15 = sld [smem:[#allocation10_spill]]  ;;  %23 = sbr.rel (!%p21_p0) target bundleno = 8 (0x8), region = 111 }
 0x371   : > { %s2806_s16 = sld [smem:[#allocation12_spill]] }
 0x372   : > { %s2807_s17 = sld [smem:[#allocation13_spill]] }
 0x373   : > { %s2809_s12 = smov %s2802_s10 }
 0x375   :  { %1536 = vsyncpa [#allocation5], 1 }
 0x376   :  { %1538 = vsyncpa [#allocation5 + $0x1], 1 }

</bundles_post_ra>
